<compile_context>
chip_gen: v5e
topology: v5e:2x2
jax: 0.10.0
libtpu: 0.0.40
codegen_flags: <defaults>
</compile_context>

<pallas_src>
import jax
import jax.numpy as jnp
from jax.experimental import pallas as pl
from jax.experimental.pallas import tpu as pltpu


def _linear_t_kernel(xt_ref, w_ref, b_ref, ot_ref):
    """out^T = W @ x^T + b, computed with VPU broadcast multiply-adds.

    xt_ref: [F_in, B_tile]   (lane dim = batch)
    w_ref:  [F_out, F_in]
    b_ref:  [F_out, 1]
    ot_ref: [F_out, B_tile]
    """
    xt = xt_ref[...].astype(jnp.float32)
    w = w_ref[...].astype(jnp.float32)
    f_in = w_ref.shape[1]

    acc = jnp.zeros(ot_ref.shape, jnp.float32)
    for k in range(f_in):                                  # static unroll: F_in == 2
        acc = acc + w[:, k:k + 1] * xt[k:k + 1, :]         # [F_out,1]*[1,B] -> [F_out,B]
    ot_ref[...] = (acc + b_ref[...].astype(jnp.float32)).astype(ot_ref.dtype)


def prepare_params(weight, bias):
    """One-time relayout of torch-style parameters (hoisted out of the forward)."""
    w = jnp.asarray(weight)                                # [F_out, F_in], used directly
    b_col = jnp.asarray(bias).reshape(-1, 1)               # [F_out, 1] (broadcasts over lanes)
    return w, b_col


def embedding_net_forward(x, w, b_col, *, tile_b=2048):
    """Pallas forward for EmbeddingNet: Linear(F_in, F_out).

    x:     [B, F_in]
    w:     [F_out, F_in]   (from prepare_params)
    b_col: [F_out, 1]      (from prepare_params)
    returns [B, F_out]
    """
    B, F_in = x.shape
    F_out = w.shape[0]
    xt = x.T                                               # [F_in, B]: lane-dense loads

    out_shape = jax.ShapeDtypeStruct((F_out, B), x.dtype)

    if B >= 2 * tile_b and B % tile_b == 0:
        # Batch-tiled path: W / b resident in VMEM across the grid; batch axis
        # is "parallel" so v7x runs it on both TensorCores.
        out_t = pl.pallas_call(
            _linear_t_kernel,
            out_shape=out_shape,
            grid=(B // tile_b,),
            in_specs=[
                pl.BlockSpec((F_in, tile_b), lambda i: (0, i)),
                pl.BlockSpec((F_out, F_in), lambda i: (0, 0)),
                pl.BlockSpec((F_out, 1), lambda i: (0, 0)),
            ],
            out_specs=pl.BlockSpec((F_out, tile_b), lambda i: (0, i)),
            compiler_params=pltpu.CompilerParams(
                dimension_semantics=("parallel",)),
        )(xt, w, b_col)
    else:
        # Small-batch path: no grid, no pipeline machinery -- whole arrays in VMEM.
        out_t = pl.pallas_call(
            _linear_t_kernel,
            out_shape=out_shape,
            in_specs=[pl.BlockSpec(memory_space=pltpu.MemorySpace.VMEM)] * 3,
            out_specs=pl.BlockSpec(memory_space=pltpu.MemorySpace.VMEM),
        )(xt, w, b_col)

    return out_t.T                                         # back to [B, F_out]


if __name__ == "__main__":
    key = jax.random.PRNGKey(0)
    k_x, k_w, k_b, k_x2 = jax.random.split(key, 4)

    F_in, F_out = 2, 2

    # Deterministic params (mimics torch.nn.Linear's U(-1/sqrt(fan_in), 1/sqrt(fan_in))).
    bound = 1.0 / (F_in ** 0.5)
    weight = jax.random.uniform(k_w, (F_out, F_in), jnp.float32, -bound, bound)
    bias = jax.random.uniform(k_b, (F_out,), jnp.float32, -bound, bound)
    w, b_col = prepare_params(weight, bias)

    # Small batch (gridless VMEM path) -- the module's typical use.
    B = 8
    x = jax.random.normal(k_x, (B, F_in), jnp.float32)
    out = jax.block_until_ready(embedding_net_forward(x, w, b_col))
    ref = x @ weight.T + bias
    assert out.shape == (B, F_out)
    assert jnp.allclose(out, ref, atol=1e-5, rtol=1e-5)

    # Large batch (batch-tiled "parallel" grid path), still tiny memory-wise.
    B2 = 4096
    x2 = jax.random.normal(k_x2, (B2, F_in), jnp.float32)
    out2 = jax.block_until_ready(embedding_net_forward(x2, w, b_col))
    ref2 = x2 @ weight.T + bias
    assert out2.shape == (B2, F_out)
    assert jnp.allclose(out2, ref2, atol=1e-5, rtol=1e-5)

    print("KERNEL_OK")
</pallas_src>

<mosaic_0001>
module attributes {stable_mosaic.version = 11 : i64} {
  func.func @_linear_t_kernel(%arg0: memref<2x8xf32, #tpu.memory_space<vmem>>, %arg1: memref<2x2xf32, #tpu.memory_space<vmem>>, %arg2: memref<2x1xf32, #tpu.memory_space<vmem>>, %arg3: memref<2x8xf32, #tpu.memory_space<vmem>>) attributes {dimension_semantics = [], scalar_prefetch = 0 : i64, scratch_operands = 0 : i64, tpu.core_type = #tpu.core_type<tc>} {
    %c0 = arith.constant 0 : index
    %c0_0 = arith.constant 0 : index
    %0 = vector.load %arg0[%c0, %c0_0] : memref<2x8xf32, #tpu.memory_space<vmem>>, vector<2x8xf32>
    %c0_1 = arith.constant 0 : index
    %c0_2 = arith.constant 0 : index
    %1 = vector.load %arg1[%c0_1, %c0_2] : memref<2x2xf32, #tpu.memory_space<vmem>>, vector<2x2xf32>
    %cst = arith.constant 0.000000e+00 : f32
    %2 = vector.broadcast %cst : f32 to vector<2x8xf32>
    %3 = vector.extract_strided_slice %1 {offsets = [0, 0], sizes = [2, 1], strides = [1, 1]} : vector<2x2xf32> to vector<2x1xf32>
    %4 = vector.extract_strided_slice %0 {offsets = [0, 0], sizes = [1, 8], strides = [1, 1]} : vector<2x8xf32> to vector<1x8xf32>
    %5 = vector.broadcast %3 : vector<2x1xf32> to vector<2x8xf32>
    %6 = vector.broadcast %4 : vector<1x8xf32> to vector<2x8xf32>
    %7 = arith.mulf %5, %6 : vector<2x8xf32>
    %8 = arith.addf %2, %7 : vector<2x8xf32>
    %9 = vector.extract_strided_slice %1 {offsets = [0, 1], sizes = [2, 1], strides = [1, 1]} : vector<2x2xf32> to vector<2x1xf32>
    %10 = vector.extract_strided_slice %0 {offsets = [1, 0], sizes = [1, 8], strides = [1, 1]} : vector<2x8xf32> to vector<1x8xf32>
    %11 = vector.broadcast %9 : vector<2x1xf32> to vector<2x8xf32>
    %12 = vector.broadcast %10 : vector<1x8xf32> to vector<2x8xf32>
    %13 = arith.mulf %11, %12 : vector<2x8xf32>
    %14 = arith.addf %8, %13 : vector<2x8xf32>
    %c0_3 = arith.constant 0 : index
    %c0_4 = arith.constant 0 : index
    %15 = vector.load %arg2[%c0_3, %c0_4] : memref<2x1xf32, #tpu.memory_space<vmem>>, vector<2x1xf32>
    %16 = vector.broadcast %15 : vector<2x1xf32> to vector<2x8xf32>
    %17 = arith.addf %14, %16 : vector<2x8xf32>
    %c0_5 = arith.constant 0 : index
    %c0_6 = arith.constant 0 : index
    %18 = vector.load %arg3[%c0_5, %c0_6] : memref<2x8xf32, #tpu.memory_space<vmem>>, vector<2x8xf32>
    tpu.vector_store %arg3[%c0_5, %c0_6], %17 {strides = array<i32>} : memref<2x8xf32, #tpu.memory_space<vmem>>, vector<2x8xf32>,
    return
  }
}

</mosaic_0001>

<bundles_post_ra>
// kernel: tpu_custom_call.1
= control target key start
LH: loop header
LB: loop body
LE: loop exit
PB: predicated region body
PF: predicated region fallthrough
CT: control target
= control target key end

     0   :  { %8 = vsyncpa [#allocation3], 0  ;;  %s168_s0 = inlined_call_operand.vmem [shape: f32[2,8], index: 0, kind: input, shape index: {}]   ;;  %s169_s1 = inlined_call_operand.hbm [shape: f32[2,2], index: 1, kind: input, shape index: {}]   ;;  %s170_s2 = inlined_call_operand.vmem [shape: f32[2,1], index: 2, kind: input, shape index: {}]   ;;  %s171_s3 = inlined_call_operand.hbm [shape: f32[2,8], index: 3, kind: output, shape index: {}]  }
   0x1   :  { %9 = vsyncpa [#allocation4], 0  ;;  %s17_s14 = sshll.u32 %s169_s1, 4  ;;  %s132_s15 = smov [#allocation2]   ;;  %s18_s14 = int_to_ptr.hbm [resolvable:$true] %s17_s14 }
   0x2   :  { %s19_s16 = sshll.u32 %s132_s15, 4  ;;  %s20_s16 = int_to_ptr.vmem [resolvable:$true] %s19_s16 }
   0x3   :  { %22 = dma.hbm_to_vmem [thread:$0]  %s18_s14, 32, %s20_s16, [#allocation3]  }
   0x4   :  { %128 = dma.done.wait [#allocation3], 32  }
   0x5   :  { %129 = vsyncadd [#allocation3], 4294967264  ;;  %v133_v0 = vmov 0   ;;  %v30_v1 = vld [vmem:[#allocation2] sm:$0x3]  ;;  %v134_v3 = vmov 1  }
   0x6   :  { %76 = vset.pattern.permute.xlu0 %v133_v0  ;;  %78 = vset.pattern.permute.xlu1 %v133_v0  ;;  %v46_v2 = vld [vmem:[%s170_s2] sm:$0x3]  ;;  %s135_s20 = smov [#allocation5]   ;;  %s62_s23 = sshll.u32 %s171_s3, 4  ;;  %vm53_vm0 = vcmask 58368   ;;  %s63_s23 = int_to_ptr.hbm [resolvable:$true] %s62_s23 }
   0x7   :  { %33 = vperm.xlu0 %76, %v30_v1   ;;  %49 = vperm.xlu1 %78, %v46_v2   ;;  %v29_v5 = vld [vmem:[%s168_s0] sm:$0x3]  ;;  %s60_s21 = sshll.u32 %s135_s20, 4  ;;  %s61_s21 = int_to_ptr.vmem [resolvable:$true] %s60_s21 }
   0x8   :  { %v36_v6 = vperm.slane %v29_v5, 0  ;;  %v43_v7 = vperm.slane %v29_v5, 1 }
   0xf   :  { %77 = vset.pattern.permute.xlu0 %v134_v3 }
  0x10   :  { %40 = vperm.xlu0 %77, %v30_v1  }
  0x18   :  { %79 = vset.pattern.permute.xlu0 %v133_v0 }
  0x79   :  { %v34_v4 = vpop.permute.xlu0 %33  ;;  %v50_v11 = vpop.permute.xlu1 %49 }
  0x7a   :  { %v37_v9 = vmul.f32 %v36_v6, %v34_v4 }
  0x82   :  { %v41_v8 = vpop.permute.xlu0 %40 }
  0x83   :  { %v44_v10 = vmul.f32 %v43_v7, %v41_v8 }
  0x85   :  { %v45_v12 = vadd.f32 %v44_v10, %v37_v9 }
  0x87   :  { %v52_v13 = vadd.f32 %v50_v11, %v45_v12 }
  0x89   :  { %54 = vst.msk [vmem:[#allocation5] sm:$0x3] %vm53_vm0, %v52_v13 }
  0x8a   :  { %65 = dma.vmem_to_hbm [thread:$0]  %s61_s21, 32, %s63_s23, [#allocation4]  }
  0x8b   :  { %130 = dma.done.wait [#allocation4], 32  }
  0x8c   :  { %131 = vsyncadd [#allocation4], 4294967264 }
  0x8d   :  { %70 = vsyncpa [#allocation3], 1 }
  0x8e   :  { %71 = vsyncpa [#allocation4], 1 }

</bundles_post_ra>
